<compile_context>
chip_gen: v7x
topology: tpu7x:2x2x1
jax: 0.10.0
libtpu: 0.0.40
codegen_flags: <defaults>
</compile_context>

<pallas_src>
import math
from functools import partial

import jax
import jax.numpy as jnp
from jax import lax
from jax.experimental import pallas as pl
from jax.experimental.pallas import tpu as pltpu


_NEG_LARGE = -1e30      # finite stand-in for -inf (keeps online softmax NaN-free)
_LANE = 128

_BLK_SKIP = 0           # block fully masked  -> skip matmuls entirely
_BLK_MIX = 1            # block partially masked -> apply the mask tile
_BLK_FULL = 2           # block fully visible -> no mask needed


# ----------------------------------------------------------------------------- helpers
def _round_up(x, m):
    return ((x + m - 1) // m) * m


def _pick_tile(s, cap, align):
    """Largest divisor of s that is <= cap and a multiple of `align`; else s (one tile)."""
    if s <= cap:
        return s
    t = (min(cap, s) // align) * align
    while t >= align:
        if s % t == 0:
            return t
        t -= align
    return s


def _pick_vmem_limit():
    """<= 48 MiB everywhere unless we can see a larger physical VMEM (v5e/v6e)."""
    cap = None
    try:
        cap = getattr(pltpu.get_tpu_info(), "vmem_capacity_bytes", None)
    except Exception:
        cap = None
    if not cap:
        return 48 * 1024 * 1024
    return int(min(64 * 1024 * 1024, cap * 3 // 4))


# ----------------------------------------------------------------------------- kernels
def _online_softmax_step(qs, k, v, s, m_sc, l_sc, acc_sc):
    """One kv-tile update of the running (m, l, acc) statistics (all f32)."""
    m_prev = m_sc[...]                                       # (tq, 1)
    m_new = jnp.maximum(m_prev, jnp.max(s, axis=-1, keepdims=True))
    alpha = jnp.exp(m_prev - m_new)
    p = jnp.exp(s - m_new)                                   # (tq, tkv) f32
    l_sc[...] = alpha * l_sc[...] + jnp.sum(p, axis=-1, keepdims=True)
    acc_sc[...] = alpha * acc_sc[...] + jnp.dot(
        p.astype(v.dtype), v, preferred_element_type=jnp.float32)
    m_sc[...] = m_new


def _init_scratch(q_ref, qs_sc, m_sc, l_sc, acc_sc, scale):
    # Hoist q * scale out of the kv loop: written once per q tile, read each step.
    qs_sc[...] = q_ref[0] * jnp.asarray(scale, dtype=q_ref.dtype)
    m_sc[...] = jnp.full_like(m_sc, _NEG_LARGE)
    l_sc[...] = jnp.zeros_like(l_sc)
    acc_sc[...] = jnp.zeros_like(acc_sc)


def _finalize(o_ref, m_sc, l_sc, acc_sc):
    l = l_sc[...]
    # Guard rows with no visible keys (l == 0): output 0 instead of NaN.
    l_safe = jnp.where(l > 0.0, l, 1.0)
    o_ref[0] = (acc_sc[...] * pl.reciprocal(l_safe, approx=True)).astype(o_ref.dtype)


def _sdpa_nomask_kernel(q_ref, k_ref, v_ref, o_ref,
                        qs_sc, m_sc, l_sc, acc_sc, *, scale, kv_valid, tkv):
    """Un-masked attention; `kv_valid` (static) masks padded kv columns if S was padded."""
    ki = pl.program_id(2)

    @pl.when(ki == 0)
    def _init():
        _init_scratch(q_ref, qs_sc, m_sc, l_sc, acc_sc, scale)

    k = k_ref[0]                                             # (tkv, D) bf16
    v = v_ref[0]                                             # (tkv, D) bf16
    s = lax.dot_general(qs_sc[...], k,
                        dimension_numbers=(((1,), (1,)), ((), ())),
                        preferred_element_type=jnp.float32)  # (tq, tkv) f32

    if kv_valid is not None:   # sequence was padded -> mask padded key columns
        col = ki * tkv + lax.broadcasted_iota(jnp.int32, s.shape, 1)
        s = jnp.where(col < kv_valid, s, _NEG_LARGE)

    _online_softmax_step(qs_sc[...], k, v, s, m_sc, l_sc, acc_sc)

    @pl.when(ki == pl.num_programs(2) - 1)
    def _fin():
        _finalize(o_ref, m_sc, l_sc, acc_sc)


def _sdpa_masked_kernel(bt_ref, kvix_ref, mskix_ref,          # scalar-prefetch (SMEM)
                        q_ref, k_ref, v_ref, mask_ref, o_ref,
                        qs_sc, m_sc, l_sc, acc_sc, *, scale, nq, nkv):
    """Masked attention with block-level skipping (block type table in SMEM)."""
    del kvix_ref, mskix_ref                                   # used only by index_maps
    b = pl.program_id(0)
    qi = pl.program_id(1)
    ki = pl.program_id(2)
    blk = bt_ref[(b * nq + qi) * nkv + ki]                    # 0 skip / 1 mixed / 2 full

    @pl.when(ki == 0)
    def _init():
        _init_scratch(q_ref, qs_sc, m_sc, l_sc, acc_sc, scale)

    @pl.when(blk != _BLK_SKIP)
    def _step():
        k = k_ref[0]
        v = v_ref[0]
        s = lax.dot_general(qs_sc[...], k,
                            dimension_numbers=(((1,), (1,)), ((), ())),
                            preferred_element_type=jnp.float32)
        # Fully-visible blocks keep everything; mixed blocks use the int8 mask tile.
        keep = jnp.logical_or(blk == _BLK_FULL, mask_ref[0] != 0)
        s = jnp.where(keep, s, _NEG_LARGE)
        _online_softmax_step(qs_sc[...], k, v, s, m_sc, l_sc, acc_sc)

    @pl.when(ki == pl.num_programs(2) - 1)
    def _fin():
        _finalize(o_ref, m_sc, l_sc, acc_sc)


# ----------------------------------------------------------------------------- wrapper
def scaled_dot_product_attention(q, k, v, mask=None, *, dk=64,
                                 q_tile=512, kv_tile=1024,
                                 compute_dtype=jnp.bfloat16):
    """Pallas TPU implementation of ScaledDotProductAttention.forward.

    q, k, v: [B, S, D]. mask: optional [B, S, S] (bool / int), 1 = keep.
    dk: scaling dim; defaults to 64 to match the nn.Module's constructor default.
    """
    B, S, D = q.shape
    out_dtype = q.dtype
    scale = 1.0 / math.sqrt(dk)

    # bf16 matmul inputs (f32 accumulation stays inside the kernel).
    qc = q.astype(compute_dtype)
    kc = k.astype(compute_dtype)
    vc = v.astype(compute_dtype)

    # ---- sequence padding & tile selection -------------------------------------
    if S % _LANE == 0 or S <= max(q_tile, kv_tile):
        S_p = S                                # divisible, or a single full-axis tile
    else:
        S_p = _round_up(S, _LANE)              # pad instead of one giant tile

    tq = _pick_tile(S_p, q_tile, _LANE)
    tkv = _pick_tile(S_p, kv_tile, _LANE)

    # v7x has 2 TensorCores: make sure the parallel axes carry >= 2 blocks.
    if B * (S_p // tq) < 2:
        half = tq // 2
        if half >= _LANE and half % _LANE == 0 and S_p % half == 0:
            tq = half

    padded = S_p != S
    if padded:
        pad = S_p - S
        qc = jnp.pad(qc, ((0, 0), (0, pad), (0, 0)))
        kc = jnp.pad(kc, ((0, 0), (0, pad), (0, 0)))
        vc = jnp.pad(vc, ((0, 0), (0, pad), (0, 0)))

    grid = (B, S_p // tq, S_p // tkv)
    nq, nkv = grid[1], grid[2]

    # TODO(synk): D=64 output is not lane-dense (half of 128 lanes idle) and
    # under-fills the MXU contraction; the module's single-head [B, S, D] layout
    # is kept as-is rather than packing heads/batches into the lane dimension.
    scratch = [
        pltpu.VMEM((tq, D), compute_dtype),    # scaled q tile (written at kv_i == 0)
        pltpu.VMEM((tq, 1), jnp.float32),      # running row max
        pltpu.VMEM((tq, 1), jnp.float32),      # running softmax denominator
        pltpu.VMEM((tq, D), jnp.float32),      # running P @ V accumulator
    ]
    cparams = pltpu.CompilerParams(
        dimension_semantics=("parallel", "parallel", "arbitrary"),
        vmem_limit_bytes=_pick_vmem_limit(),
    )
    out_shape = jax.ShapeDtypeStruct((B, S_p, D), out_dtype)

    if mask is None:
        # No mask input at all: no dense [B,S,S] allocation, DMA, or jnp.where
        # (except a cheap iota guard on padded kv columns).
        q_spec = pl.BlockSpec((1, tq, D), lambda b, qi, ki: (b, qi, 0))
        k_spec = pl.BlockSpec((1, tkv, D), lambda b, qi, ki: (b, ki, 0))
        v_spec = pl.BlockSpec((1, tkv, D), lambda b, qi, ki: (b, ki, 0))
        o_spec = pl.BlockSpec((1, tq, D), lambda b, qi, ki: (b, qi, 0))
        out = pl.pallas_call(
            partial(_sdpa_nomask_kernel, scale=scale,
                    kv_valid=(S if padded else None), tkv=tkv),
            out_shape=out_shape,
            grid_spec=pltpu.PrefetchScalarGridSpec(
                num_scalar_prefetch=0,
                grid=grid,
                in_specs=[q_spec, k_spec, v_spec],
                out_specs=o_spec,
                scratch_shapes=scratch,
            ),
            compiler_params=cparams,
        )(qc, kc, vc)
        return out[:, :S, :] if padded else out

    # ---- masked path: per-block metadata for skipping + DMA dedup ---------------
    mask_b = (mask != 0)
    if padded:
        pad = S_p - S
        mask_b = jnp.pad(mask_b, ((0, 0), (0, pad), (0, pad)), constant_values=False)

    mb = mask_b.reshape(B, nq, tq, nkv, tkv)
    any_vis = jnp.any(mb, axis=(2, 4))                        # [B, nq, nkv]
    all_vis = jnp.all(mb, axis=(2, 4))
    block_type = any_vis.astype(jnp.int32) + all_vis.astype(jnp.int32)   # 0/1/2
    ki_iota = jnp.arange(nkv, dtype=jnp.int32)[None, None, :]
    # Carry-forward index tables: skipped blocks reuse the previously loaded K/V
    # block; non-mixed blocks reuse the previously loaded mask block (no re-DMA).
    kv_idx = jnp.maximum(lax.cummax(jnp.where(any_vis, ki_iota, -1), axis=2), 0)
    msk_idx = jnp.maximum(
        lax.cummax(jnp.where(block_type == _BLK_MIX, ki_iota, -1), axis=2), 0)

    bt_flat = block_type.reshape(-1).astype(jnp.int32)
    kv_flat = kv_idx.reshape(-1).astype(jnp.int32)
    mi_flat = msk_idx.reshape(-1).astype(jnp.int32)
    mask_i8 = mask_b.astype(jnp.int8)                         # 4x less HBM than int32

    def _flat(b, qi, ki):
        return (b * nq + qi) * nkv + ki

    q_spec = pl.BlockSpec((1, tq, D), lambda b, qi, ki, bt, kvx, mx: (b, qi, 0))
    k_spec = pl.BlockSpec((1, tkv, D),
                          lambda b, qi, ki, bt, kvx, mx: (b, kvx[_flat(b, qi, ki)], 0))
    v_spec = pl.BlockSpec((1, tkv, D),
                          lambda b, qi, ki, bt, kvx, mx: (b, kvx[_flat(b, qi, ki)], 0))
    m_spec = pl.BlockSpec((1, tq, tkv),
                          lambda b, qi, ki, bt, kvx, mx: (b, qi, mx[_flat(b, qi, ki)]))
    o_spec = pl.BlockSpec((1, tq, D), lambda b, qi, ki, bt, kvx, mx: (b, qi, 0))

    out = pl.pallas_call(
        partial(_sdpa_masked_kernel, scale=scale, nq=nq, nkv=nkv),
        out_shape=out_shape,
        grid_spec=pltpu.PrefetchScalarGridSpec(
            num_scalar_prefetch=3,
            grid=grid,
            in_specs=[q_spec, k_spec, v_spec, m_spec],
            out_specs=o_spec,
            scratch_shapes=scratch,
        ),
        compiler_params=cparams,
    )(bt_flat, kv_flat, mi_flat, qc, kc, vc, mask_i8)
    return out[:, :S, :] if padded else out


# ----------------------------------------------------------------------------- reference
def _reference(q, k, v, mask=None, dk=64):
    scale = 1.0 / math.sqrt(dk)
    score = jnp.einsum("bqd,bkd->bqk",
                       q.astype(jnp.float32), k.astype(jnp.float32)) * scale
    if mask is not None:
        score = jnp.where(mask != 0, score, -jnp.inf)
    p = jax.nn.softmax(score, axis=-1)
    return jnp.einsum("bqk,bkd->bqd", p, v.astype(jnp.float32))


if __name__ == "__main__":
    key = jax.random.PRNGKey(0)
    B, D = 2, 64
    # bf16 matmuls vs f32 reference -> loose-but-meaningful tolerance.
    ATOL = 5e-2

    def run_case(S, q_tile, kv_tile):
        ks = jax.random.split(jax.random.fold_in(key, S), 3)
        q = jax.random.normal(ks[0], (B, S, D), dtype=jnp.float32)
        k = jax.random.normal(ks[1], (B, S, D), dtype=jnp.float32)
        v = jax.random.normal(ks[2], (B, S, D), dtype=jnp.float32)
        causal = jnp.tril(jnp.ones((S, S), dtype=jnp.int32))[None].repeat(B, axis=0)

        out = jax.block_until_ready(
            scaled_dot_product_attention(q, k, v, q_tile=q_tile, kv_tile=kv_tile))
        out_m = jax.block_until_ready(
            scaled_dot_product_attention(q, k, v, mask=causal,
                                         q_tile=q_tile, kv_tile=kv_tile))
        assert jnp.allclose(out, _reference(q, k, v), atol=ATOL, rtol=ATOL), f"nomask S={S}"
        assert jnp.allclose(out_m, _reference(q, k, v, causal),
                            atol=ATOL, rtol=ATOL), f"masked S={S}"

    # Small example consistent with the module (single-tile fast path).
    run_case(8, 512, 1024)
    # Multi-tile online softmax; causal mask exercises skip / mixed / full blocks.
    run_case(256, 128, 128)
    # Non-multiple-of-128 sequence -> padded path (S=200 -> 256), masked + unmasked.
    run_case(200, 128, 128)

    print("KERNEL_OK")
</pallas_src>

<mosaic_0001>
module attributes {stable_mosaic.version = 11 : i64} {
  func.func @_sdpa_nomask_kernel(%arg0: i32, %arg1: i32, %arg2: i32, %arg3: memref<1x8x64xbf16, #tpu.memory_space<vmem>>, %arg4: memref<1x8x64xbf16, #tpu.memory_space<vmem>>, %arg5: memref<1x8x64xbf16, #tpu.memory_space<vmem>>, %arg6: memref<1x8x64xf32, #tpu.memory_space<vmem>>, %arg7: memref<8x64xbf16, #tpu.memory_space<vmem>>, %arg8: memref<8x1xf32, #tpu.memory_space<vmem>>, %arg9: memref<8x1xf32, #tpu.memory_space<vmem>>, %arg10: memref<8x64xf32, #tpu.memory_space<vmem>>) attributes {dimension_semantics = [#tpu.dimension_semantics<parallel>, #tpu.dimension_semantics<parallel>, #tpu.dimension_semantics<arbitrary>], iteration_bounds = array<i64: 2, 1, 1>, scalar_prefetch = 0 : i64, scratch_operands = 4 : i64, tpu.core_type = #tpu.core_type<tc>, window_params = [{transform_indices = @transform_0, window_bounds = array<i64: 1, 8, 64>}, {transform_indices = @transform_1, window_bounds = array<i64: 1, 8, 64>}, {transform_indices = @transform_2, window_bounds = array<i64: 1, 8, 64>}, {transform_indices = @transform_3, window_bounds = array<i64: 1, 8, 64>}]} {
    %c0_i32 = arith.constant 0 : i32
    %0 = arith.cmpi eq, %arg2, %c0_i32 : i32
    %1 = arith.extui %0 : i1 to i32
    %c0_i32_0 = arith.constant 0 : i32
    %2 = arith.cmpi ne, %1, %c0_i32_0 : i32
    scf.if %2 {
      %c0_25 = arith.constant 0 : index
      %c0_26 = arith.constant 0 : index
      %c0_27 = arith.constant 0 : index
      %35 = vector.load %arg3[%c0_25, %c0_26, %c0_27] : memref<1x8x64xbf16, #tpu.memory_space<vmem>>, vector<1x8x64xbf16>
      %36 = vector.shape_cast %35 : vector<1x8x64xbf16> to vector<8x64xbf16>
      %cst_28 = arith.constant 1.250000e-01 : bf16
      %37 = vector.broadcast %cst_28 : bf16 to vector<8x64xbf16>
      %38 = arith.mulf %36, %37 : vector<8x64xbf16>
      %c0_29 = arith.constant 0 : index
      %c0_30 = arith.constant 0 : index
      %39 = vector.load %arg7[%c0_29, %c0_30] : memref<8x64xbf16, #tpu.memory_space<vmem>>, vector<8x64xbf16>
      tpu.vector_store %arg7[%c0_29, %c0_30], %38 {strides = array<i32>} : memref<8x64xbf16, #tpu.memory_space<vmem>>, vector<8x64xbf16>,
      %cst_31 = arith.constant -1.000000e+30 : f32
      %40 = vector.broadcast %cst_31 : f32 to vector<8x1xf32>
      %c0_32 = arith.constant 0 : index
      %c0_33 = arith.constant 0 : index
      %41 = vector.load %arg8[%c0_32, %c0_33] : memref<8x1xf32, #tpu.memory_space<vmem>>, vector<8x1xf32>
      tpu.vector_store %arg8[%c0_32, %c0_33], %40 {strides = array<i32>} : memref<8x1xf32, #tpu.memory_space<vmem>>, vector<8x1xf32>,
      %cst_34 = arith.constant 0.000000e+00 : f32
      %42 = vector.broadcast %cst_34 : f32 to vector<8x1xf32>
      %c0_35 = arith.constant 0 : index
      %c0_36 = arith.constant 0 : index
      %43 = vector.load %arg9[%c0_35, %c0_36] : memref<8x1xf32, #tpu.memory_space<vmem>>, vector<8x1xf32>
      tpu.vector_store %arg9[%c0_35, %c0_36], %42 {strides = array<i32>} : memref<8x1xf32, #tpu.memory_space<vmem>>, vector<8x1xf32>,
      %cst_37 = arith.constant 0.000000e+00 : f32
      %44 = vector.broadcast %cst_37 : f32 to vector<8x64xf32>
      %c0_38 = arith.constant 0 : index
      %c0_39 = arith.constant 0 : index
      %45 = vector.load %arg10[%c0_38, %c0_39] : memref<8x64xf32, #tpu.memory_space<vmem>>, vector<8x64xf32>
      tpu.vector_store %arg10[%c0_38, %c0_39], %44 {strides = array<i32>} : memref<8x64xf32, #tpu.memory_space<vmem>>, vector<8x64xf32>,
    } else {
    }
    %c0 = arith.constant 0 : index
    %c0_1 = arith.constant 0 : index
    %c0_2 = arith.constant 0 : index
    %3 = vector.load %arg4[%c0, %c0_1, %c0_2] : memref<1x8x64xbf16, #tpu.memory_space<vmem>>, vector<1x8x64xbf16>
    %4 = vector.shape_cast %3 : vector<1x8x64xbf16> to vector<8x64xbf16>
    %c0_3 = arith.constant 0 : index
    %c0_4 = arith.constant 0 : index
    %c0_5 = arith.constant 0 : index
    %5 = vector.load %arg5[%c0_3, %c0_4, %c0_5] : memref<1x8x64xbf16, #tpu.memory_space<vmem>>, vector<1x8x64xbf16>
    %6 = vector.shape_cast %5 : vector<1x8x64xbf16> to vector<8x64xbf16>
    %c0_6 = arith.constant 0 : index
    %c0_7 = arith.constant 0 : index
    %7 = vector.load %arg7[%c0_6, %c0_7] : memref<8x64xbf16, #tpu.memory_space<vmem>>, vector<8x64xbf16>
    %cst = arith.constant dense<0.000000e+00> : vector<8x8xf32>
    %8 = tpu.matmul %7, %4, %cst {dimension_numbers = #tpu.dot_dimension_numbers<[1], [1], [0], [0], [0, 0, 1, 0], [], []>} : vector<8x64xbf16>, vector<8x64xbf16>, vector<8x8xf32> -> vector<8x8xf32>
    %c0_8 = arith.constant 0 : index
    %c0_9 = arith.constant 0 : index
    %9 = vector.load %arg8[%c0_8, %c0_9] : memref<8x1xf32, #tpu.memory_space<vmem>>, vector<8x1xf32>
    %cst_10 = arith.constant dense<0xFF800000> : vector<8xf32>
    %10 = vector.multi_reduction <maximumf>, %8, %cst_10 [1] : vector<8x8xf32> to vector<8xf32>
    %11 = vector.shape_cast %10 : vector<8xf32> to vector<8x1xf32>
    %12 = arith.maximumf %9, %11 : vector<8x1xf32>
    %13 = arith.subf %9, %12 : vector<8x1xf32>
    %14 = math.exp %13 : vector<8x1xf32>
    %15 = vector.broadcast %12 : vector<8x1xf32> to vector<8x8xf32>
    %16 = arith.subf %8, %15 : vector<8x8xf32>
    %17 = math.exp %16 : vector<8x8xf32>
    %c0_11 = arith.constant 0 : index
    %c0_12 = arith.constant 0 : index
    %18 = vector.load %arg9[%c0_11, %c0_12] : memref<8x1xf32, #tpu.memory_space<vmem>>, vector<8x1xf32>
    %19 = arith.mulf %14, %18 : vector<8x1xf32>
    %cst_13 = arith.constant dense<0.000000e+00> : vector<8xf32>
    %20 = vector.multi_reduction <add>, %17, %cst_13 [1] : vector<8x8xf32> to vector<8xf32>
    %21 = vector.shape_cast %20 : vector<8xf32> to vector<8x1xf32>
    %22 = arith.addf %19, %21 : vector<8x1xf32>
    %c0_14 = arith.constant 0 : index
    %c0_15 = arith.constant 0 : index
    %23 = vector.load %arg9[%c0_14, %c0_15] : memref<8x1xf32, #tpu.memory_space<vmem>>, vector<8x1xf32>
    tpu.vector_store %arg9[%c0_14, %c0_15], %22 {strides = array<i32>} : memref<8x1xf32, #tpu.memory_space<vmem>>, vector<8x1xf32>,
    %c0_16 = arith.constant 0 : index
    %c0_17 = arith.constant 0 : index
    %24 = vector.load %arg10[%c0_16, %c0_17] : memref<8x64xf32, #tpu.memory_space<vmem>>, vector<8x64xf32>
    %25 = vector.broadcast %14 : vector<8x1xf32> to vector<8x64xf32>
    %26 = arith.mulf %25, %24 : vector<8x64xf32>
    %27 = arith.truncf %17 : vector<8x8xf32> to vector<8x8xbf16>
    %cst_18 = arith.constant dense<0.000000e+00> : vector<8x64xf32>
    %28 = tpu.matmul %27, %6, %cst_18 {dimension_numbers = #tpu.dot_dimension_numbers<[1], [0], [0], [1], [0, 0, 1, 1], [], []>} : vector<8x8xbf16>, vector<8x64xbf16>, vector<8x64xf32> -> vector<8x64xf32>
    %29 = arith.addf %26, %28 : vector<8x64xf32>
    %c0_19 = arith.constant 0 : index
    %c0_20 = arith.constant 0 : index
    %30 = vector.load %arg10[%c0_19, %c0_20] : memref<8x64xf32, #tpu.memory_space<vmem>>, vector<8x64xf32>
    tpu.vector_store %arg10[%c0_19, %c0_20], %29 {strides = array<i32>} : memref<8x64xf32, #tpu.memory_space<vmem>>, vector<8x64xf32>,
    %c0_21 = arith.constant 0 : index
    %c0_22 = arith.constant 0 : index
    %31 = vector.load %arg8[%c0_21, %c0_22] : memref<8x1xf32, #tpu.memory_space<vmem>>, vector<8x1xf32>
    tpu.vector_store %arg8[%c0_21, %c0_22], %12 {strides = array<i32>} : memref<8x1xf32, #tpu.memory_space<vmem>>, vector<8x1xf32>,
    %c0_i32_23 = arith.constant 0 : i32
    %32 = arith.cmpi eq, %arg2, %c0_i32_23 : i32
    %33 = arith.extui %32 : i1 to i32
    %c0_i32_24 = arith.constant 0 : i32
    %34 = arith.cmpi ne, %33, %c0_i32_24 : i32
    scf.if %34 {
      %c0_25 = arith.constant 0 : index
      %c0_26 = arith.constant 0 : index
      %35 = vector.load %arg9[%c0_25, %c0_26] : memref<8x1xf32, #tpu.memory_space<vmem>>, vector<8x1xf32>
      %cst_27 = arith.constant 0.000000e+00 : f32
      %36 = vector.broadcast %cst_27 : f32 to vector<8x1xf32>
      %37 = arith.cmpf ogt, %35, %36 : vector<8x1xf32>
      %cst_28 = arith.constant 1.000000e+00 : f32
      %38 = vector.broadcast %cst_28 : f32 to vector<8x1xf32>
      %39 = arith.select %37, %35, %38 : vector<8x1xi1>, vector<8x1xf32>
      %c0_29 = arith.constant 0 : index
      %c0_30 = arith.constant 0 : index
      %40 = vector.load %arg10[%c0_29, %c0_30] : memref<8x64xf32, #tpu.memory_space<vmem>>, vector<8x64xf32>
      %41 = tpu.reciprocal %39 {approx = true} : vector<8x1xf32> -> vector<8x1xf32>
      %42 = vector.broadcast %41 : vector<8x1xf32> to vector<8x64xf32>
      %43 = arith.mulf %40, %42 : vector<8x64xf32>
      %c0_31 = arith.constant 0 : index
      %c0_32 = arith.constant 0 : index
      %c0_33 = arith.constant 0 : index
      %44 = vector.load %arg6[%c0_31, %c0_32, %c0_33] : memref<1x8x64xf32, #tpu.memory_space<vmem>>, vector<1x8x64xf32>
      %45 = vector.shape_cast %44 : vector<1x8x64xf32> to vector<8x64xf32>
      %46 = vector.shape_cast %43 : vector<8x64xf32> to vector<1x8x64xf32>
      tpu.vector_store %arg6[%c0_31, %c0_32, %c0_33], %46 {strides = array<i32>} : memref<1x8x64xf32, #tpu.memory_space<vmem>>, vector<1x8x64xf32>,
    } else {
    }
    return
  }
  func.func @transform_0(%arg0: i32, %arg1: i32, %arg2: i32) -> (i32, i32, i32) {
    %c0_i32 = arith.constant 0 : i32
    %c0_i32_0 = arith.constant 0 : i32
    return %arg0, %arg1, %c0_i32 : i32, i32, i32
  }
  func.func @transform_1(%arg0: i32, %arg1: i32, %arg2: i32) -> (i32, i32, i32) {
    %c0_i32 = arith.constant 0 : i32
    %c0_i32_0 = arith.constant 0 : i32
    return %arg0, %arg2, %c0_i32 : i32, i32, i32
  }
  func.func @transform_2(%arg0: i32, %arg1: i32, %arg2: i32) -> (i32, i32, i32) {
    %c0_i32 = arith.constant 0 : i32
    %c0_i32_0 = arith.constant 0 : i32
    return %arg0, %arg2, %c0_i32 : i32, i32, i32
  }
  func.func @transform_3(%arg0: i32, %arg1: i32, %arg2: i32) -> (i32, i32, i32) {
    %c0_i32 = arith.constant 0 : i32
    %c0_i32_0 = arith.constant 0 : i32
    return %arg0, %arg1, %c0_i32 : i32, i32, i32
  }
}

</mosaic_0001>

<bundles_post_ra>
// kernel: tpu_custom_call.1
= control target key start
LH: loop header
LB: loop body
LE: loop exit
PB: predicated region body
PF: predicated region fallthrough
CT: control target
= control target key end

     0   :  { %s1196_s0 = inlined_call_operand.hbm [shape: bf16[2,8,64], index: 0, kind: input, shape index: {}]   ;;  %s1197_s1 = inlined_call_operand.hbm [shape: bf16[2,8,64], index: 1, kind: input, shape index: {}]   ;;  %s1198_s2 = inlined_call_operand.hbm [shape: bf16[2,8,64], index: 2, kind: input, shape index: {}]   ;;  %s1199_s3 = inlined_call_operand.hbm [shape: f32[2,8,64], index: 3, kind: output, shape index: {}]  }
   0x1   :  { %1205 = sst [smem:[#allocation19_spill]] %s1197_s1 }
   0x2   :  { %8 = vsyncpa [#allocation7], 0 }
   0x3   :  { %10 = vsyncpa [#allocation7 + $0x1], 0 }
   0x4   :  { %11 = vsyncpa [#allocation10], 0 }
   0x5   :  { %13 = vsyncpa [#allocation10 + $0x1], 0 }
   0x6   :  { %14 = vsyncpa [#allocation8], 0 }
   0x7   :  { %16 = vsyncpa [#allocation8 + $0x1], 0  ;;  %s920_s12 = smov 0   ;;  %s922_s13 = smov 0  }
   0x8   :  { %s924_s14 = smov 0   ;;  %s926_s15 = smov 0  }
   0x9   :  { %s928_s16 = smov 0   ;;  %s930_s17 = smov 0  }
   0xa LB: > { %1206 = sst [smem:[#allocation16_spill]] %s886_s16  ;;  %s951_s18 = sadd.s32 4294967295, %s890_s17   ;;  %s890_s17 = sphi %s930_s17, %s22_s17   ;;  %s886_s16 = sphi %s928_s16, %s1227_s16   ;;  %s882_s15 = sphi %s926_s15, %s1226_s15   ;;  %s878_s14 = sphi %s924_s14, %s1230_s14   ;;  %s874_s13 = sphi %s922_s13, %s1229_s13   ;;  %s870_s12 = sphi %s920_s12, %s1228_s12  }
   0xb   : > { %s594_s19 = sadd.s32 4294967294, %s890_s17   ;;  %s41_s20 = sadd.s32 1, %s886_s16 }
   0xc   : > { %s50_s21 = sadd.s32 1, %s878_s14  ;;  %p43_p0 = scmp.ge.s32.totalorder %s41_s20, 2 }
   0xd   : > { %p57_p1 = scmp.ne.s32.totalorder %s878_s14, %s874_s13  ;;  %p58_p2 = scmp.eq.s32.totalorder %s890_s17, 0 }
   0xe   : > { %p63_p3 = scmp.ne.s32.totalorder %s874_s13, %s870_s12  ;;  %s1232_s20 = smov (%p43_p0, %s41_s20), 0 }
   0xf   : > { %1207 = sst [smem:[#allocation17_spill]] %s1232_s20  ;;  %p963_p4 = por %p58_p2, %p57_p1 }
  0x10   : > { %p64_p5 = scmp.eq.s32.totalorder %s951_s18, 0  ;;  %s45_s23 = ssub.s32 %s886_s16, %s1232_s20 }
  0x11   : > { %p145_p6 = scmp.eq.s32.totalorder %s951_s18, 1  ;;  %p48_p7 = scmp.eq.s32.totalorder %s45_s23, 0 }
  0x12   : > { %p971_p8 = por %p64_p5, %p63_p3  ;;  %p151_p10 = scmp.eq.s32.totalorder %s594_s19, 1 }
  0x13   : > { %p975_p9 = por %p145_p6, %p57_p1  ;;  %p652_p13 = scmp.lt.s32.totalorder %s890_s17, 2 }
  0x14   : > { %s1209_s24 = scalar_select %p971_p8, 1, 0 }
  0x15   : > { %s1210_s25 = scalar_select %p975_p9, 1, 0 }
  0x16   : > { %s980_s26 = scalar_select %p48_p7, %s878_s14, %s50_s21  }
  0x17   : > { %p982_p11 = por %p151_p10, %p63_p3  ;;  %s171_s28 = sand.u32 1, %s878_s14  }
  0x18   : > { %1211 = sst [smem:[#allocation18_spill]] %s980_s26  ;;  %s991_s29 = sshll.u32 %s171_s28, 2 }
  0x19   : > { %s1212_s27 = scalar_select %p982_p11, 1, 0 }
  0x1a   : > { %s994_s30 = sshll.u32 %s886_s16, 6  ;;  %p998_p0 = pnand %p652_p13, %p963_p4 }
  0x1b   : > { %s190_s5 = sand.u32 1, %s890_s17   ;;  %s1214_s1 = sld [smem:[#allocation19_spill]] }
  0x1c   : > { %s1213_s4 = scalar_select %p998_p0, 1, 0 }
  0x1d   : > { %s194_s9 = scalar_lea.vmem [#allocation9], %s991_s29  ;;  %s1014_s11 = scalar_lea.sflag [#allocation10], %s190_s5 }
  0x1e   : > { %s202_s10 = sshll.u32 %s194_s9, 4  ;;  %p1020_p4 = pneg %p998_p0  ;;  %s1011_s10 = int_to_ptr.vmem [resolvable:$true] %s202_s10 }
  0x21   : > { %s1007_s8 = scalar_lea.hbm %s1214_s1, %s994_s30  ;;  %s719_s6 = scalar_lea.hbm %s1214_s1, 128 }
  0x22   : > { %s714_s19 = scalar_lea.hbm %s1007_s8, 64  ;;  %p720_p7 = scmp.lt.u32.totalorder %s1007_s8, %s1214_s1 }
  0x23   : > { %p715_p3 = scmp.ne.s32.totalorder %s1007_s8, %s714_s19  ;;  %p721_p10 = scmp.lt.u32.totalorder %s719_s6, %s714_s19 }
  0x24   : > { %p723_p12 = scmp.lt.u32.totalorder %s714_s19, %s1007_s8 }
  0x25   : > { %p717_p5 = pnand %p1020_p4, %p715_p3  ;;  %p722_p13 = por %p721_p10, %p720_p7 }
  0x27   : > { %p718_p6 = pneg %p717_p5  ;;  %p724_p1 = por %p723_p12, %p722_p13 }
  0x29   : > { %p725_p2 = pnand %p724_p1, %p718_p6 }
  0x2b   : > { %728 = shalt.err (!%p725_p2)
}
  0x2c   : > { %s729_s5 = scalar_lea.vmem %s1011_s10, 64  ;;  %s892_s22 = smov [#allocation9]  }
  0x2d   : > { %p730_p3 = scmp.ne.s32.totalorder %s1011_s10, %s729_s5  ;;  %s734_s23 = sshll.u32 %s892_s22, 4  ;;  %s735_s23 = int_to_ptr.vmem [resolvable:$false] %s734_s23 }
  0x2e   : > { %s736_s7 = scalar_lea.vmem %s735_s23, 128  ;;  %p737_p9 = scmp.lt.s32.totalorder %s1011_s10, %s735_s23 }
  0x2f   : > { %p732_p5 = pnand %p730_p3, %p1020_p4  ;;  %p738_p8 = scmp.lt.s32.totalorder %s736_s7, %s729_s5 }
  0x31   : > { %p733_p11 = pneg %p732_p5  ;;  %p739_p7 = por %p738_p8, %p737_p9 }
  0x33   : > { %p740_p10 = pnand %p739_p7, %p733_p11 }
  0x35   : > { %743 = shalt.err (!%p740_p10)
}
  0x36   : > { %644 = dma.hbm_to_vmem [thread:$0]  (!%p998_p0), %s1007_s8, 64, %s1011_s10, %s1014_s11  }
  0x37   : > { %p1216_p12 = scmp.lt.s32.totalorder %s890_s17, 3  ;;  %p1217_p1 = scmp.ge.s32.totalorder %s890_s17, 1 }
  0x38   : > { %s1056_s5 = scalar_lea.hbm %s1196_s0, %s994_s30  ;;  %s175_s22 = scalar_lea.vmem [#allocation6], %s991_s29 }
  0x39   : > { %p1048_p2 = pnand %p1217_p1, %p1216_p12  ;;  %s183_s23 = sshll.u32 %s175_s22, 4  ;;  %s1059_s23 = int_to_ptr.vmem [resolvable:$true] %s183_s23 }
  0x3a   : > { %s1065_s7 = scalar_lea.hbm %s1198_s2, %s994_s30  ;;  %s172_s1 = scalar_lea.sflag [#allocation7], %s171_s28 }
  0x3b   : > { %s1218_s19 = scalar_select %p1048_p2, 1, 0 }
  0x3c   : > { %s744_s20 = scalar_lea.hbm %s1056_s5, 64  ;;  %s749_s16 = scalar_lea.hbm %s1196_s0, 128 }
  0x3d   : > { %p745_p8 = scmp.ne.s32.totalorder %s1056_s5, %s744_s20  ;;  %p750_p6 = scmp.lt.u32.totalorder %s1056_s5, %s1196_s0 }
  0x3e   : > { %p751_p13 = scmp.lt.u32.totalorder %s749_s16, %s744_s20  ;;  %p753_p5 = scmp.lt.u32.totalorder %s744_s20, %s1056_s5 }
  0x3f   : > { %p747_p9 = pnand %p745_p8, %p1020_p4 }
  0x40   : > { %p752_p3 = por %p751_p13, %p750_p6 }
  0x41   : > { %p748_p11 = pneg %p747_p9 }
  0x42   : > { %p754_p7 = por %p753_p5, %p752_p3 }
  0x44   : > { %p755_p10 = pnand %p754_p7, %p748_p11 }
  0x46   : > { %758 = shalt.err (!%p755_p10)
}
  0x47   : > { %s759_s28 = scalar_lea.vmem %s1059_s23, 64  ;;  %s893_s30 = smov [#allocation6]  }
  0x48   : > { %p760_p12 = scmp.ne.s32.totalorder %s1059_s23, %s759_s28  ;;  %s764_s8 = sshll.u32 %s893_s30, 4  ;;  %s765_s8 = int_to_ptr.vmem [resolvable:$false] %s764_s8 }
  0x49   : > { %s766_s26 = scalar_lea.vmem %s765_s8, 128  ;;  %p767_p9 = scmp.lt.s32.totalorder %s1059_s23, %s765_s8 }
  0x4a   : > { %p762_p1 = pnand %p760_p12, %p1020_p4  ;;  %p768_p2 = scmp.lt.s32.totalorder %s766_s26, %s759_s28 }
  0x4c   : > { %p763_p8 = pneg %p762_p1  ;;  %p769_p6 = por %p768_p2, %p767_p9 }
  0x4e   : > { %p770_p13 = pnand %p769_p6, %p763_p8 }
  0x50   : > { %773 = shalt.err (!%p770_p13)
}
  0x51   : > { %641 = dma.hbm_to_vmem [thread:$0]  (!%p998_p0), %s1056_s5, 64, %s1059_s23, %s172_s1  }
  0x52   : > { %s213_s16 = scalar_lea.vmem [#allocation11], %s991_s29  ;;  %s774_s10 = scalar_lea.hbm %s1065_s7, 64 }
  0x53   : > { %s221_s20 = sshll.u32 %s213_s16, 4  ;;  %p775_p11 = scmp.ne.s32.totalorder %s1065_s7, %s774_s10  ;;  %s222_s20 = int_to_ptr.vmem [resolvable:$true] %s221_s20 }
  0x54   : > { %s779_s22 = scalar_lea.hbm %s1198_s2, 128  ;;  %p780_p5 = scmp.lt.u32.totalorder %s1065_s7, %s1198_s2 }
  0x55   : > { %p777_p2 = pnand %p775_p11, %p1020_p4  ;;  %p781_p7 = scmp.lt.u32.totalorder %s779_s22, %s774_s10 }
  0x56   : > { %p783_p12 = scmp.lt.u32.totalorder %s774_s10, %s1065_s7 }
  0x57   : > { %p778_p3 = pneg %p777_p2  ;;  %p782_p10 = por %p781_p7, %p780_p5 }
  0x59   : > { %p784_p1 = por %p783_p12, %p782_p10 }
  0x5b   : > { %p785_p8 = pnand %p784_p1, %p778_p3 }
  0x5d   : > { %788 = shalt.err (!%p785_p8)
}
  0x5e   : > { %s789_s1 = scalar_lea.vmem %s222_s20, 64  ;;  %s894_s29 = smov [#allocation11]  }
  0x5f   : > { %p790_p9 = scmp.ne.s32.totalorder %s222_s20, %s789_s1  ;;  %s794_s5 = sshll.u32 %s894_s29, 4  ;;  %s795_s5 = int_to_ptr.vmem [resolvable:$false] %s794_s5 }
  0x60   : > { %s796_s23 = scalar_lea.vmem %s795_s5, 128  ;;  %p797_p11 = scmp.lt.s32.totalorder %s222_s20, %s795_s5 }
  0x61   : > { %p792_p6 = pnand %p790_p9, %p1020_p4  ;;  %p798_p2 = scmp.lt.s32.totalorder %s796_s23, %s789_s1 }
  0x63   : > { %p793_p13 = pneg %p792_p6  ;;  %p799_p0 = por %p798_p2, %p797_p11 }
  0x65   : > { %p800_p5 = pnand %p799_p0, %p793_p13 }
  0x67   : > { %803 = shalt.err (!%p800_p5)
}
  0x68   : > { %p1219_p7 = scmp.ne.s32.totalorder %s1213_s4, 0  ;;  %p1220_p3 = scmp.ne.s32.totalorder %s1218_s19, 0 }
  0x69   : > { %s1112_s21 = sand.u32 (!%p1220_p3), 1, %s874_s13   ;;  %p1221_p0 = scmp.ne.s32.totalorder (!%p1220_p3), %s1209_s24, 0 }
  0x6a   : > { %647 = dma.hbm_to_vmem [thread:$0]  (!%p1219_p7), %s1065_s7, 64, %s222_s20, %s1014_s11  }
  0x6b   : > { %230 = sbr.rel (%p1220_p3) target bundleno = 940 (0x3ac), region = 32  ;;  %s1115_s8 = sshll.u32 (!%p1220_p3), %s1112_s21, 2 }
  0x6c   : > { %s233_s26 = scalar_lea.sflag (!%p1220_p3), [#allocation7], %s1112_s21  ;;  %s236_s16 = scalar_lea.vmem (!%p1220_p3), [#allocation6], %s1115_s8 }
  0x72   : > { %857 = dma.done.wait (%p1221_p0), %s233_s26, 64  }
  0x73   : > { %859 = vsyncadd (%p1221_p0), %s233_s26, 4294967232  ;;  %s241_s4 = sand.u32 1, %s951_s18   ;;  %s245_s19 = scalar_lea.vmem [#allocation9], %s1115_s8 }
  0x74   : > { %s242_s11 = scalar_lea.sflag [#allocation10], %s241_s4 }
  0x75   : > { %861 = dma.done.wait (%p1221_p0), %s242_s11, 128  }
  0x76   : > { %863 = vsyncadd (%p1221_p0), %s242_s11, 4294967168  ;;  %vm300_vm0 = vcmask 523264   ;;  %v895_v0 = vmov 0.0   ;;  %vm896_vm1 = vmmov 0   ;;  %v302_v1 = vld [vmem:[%s245_s19] sm:$0xf] }
  0x77   : > { %618 = vmatprep.subr.bf16.mxu0 %v895_v0  ;;  %301 = vst.msk [vmem:[#allocation5] sm:$0xff] %vm300_vm0, %v895_v0  ;;  %620 = vmatprep.mubr.msk.bf16.mxu0 %vm896_vm1, %v895_v0  ;;  %v293_v2 = vld [vmem:[%s236_s16] sm:$0xf]  ;;  %vm295_vm2 = vcmask 519168   ;;  %v310_v3 = vsel %vm300_vm0, %v302_v1, 0  ;;  %vm297_vm3 = vcmask 7168  }
  0x78   : > { %624 = vmatprep.subr.bf16.mxu1 %v895_v0  ;;  %626 = vmatprep.mubr.msk.bf16.mxu1 %vm896_vm1, %v895_v0  ;;  %v294_v4 = vmul.bf16 1040203264, %v293_v2  ;;  %v897_v6 = vmov -1e+30   ;;  %299 = vst.msk [vmem:[#allocation4] sm:$0xff] %vm297_vm3, %v895_v0  ;;  %vm353_vm4 = vcmask 64512  }
  0x79   : > { %619 = vmatpush3.bf16.xpose.msra.mxu0 %v310_v3  ;;  %298 = vst.msk [vmem:[#allocation3] sm:$0xff] %vm297_vm3, %v897_v6  ;;  %v898_v12 = vmov 0   ;;  %vm388_vm5 = vcmask 1043456   ;;  %s254_s18 = scalar_lea.vmem [#allocation11], %s1115_s8  ;;  %s607_s24 = sshll.u32 %s1112_s21, 3 }
  0x7a   : > { %296 = vst.msk [vmem:[#allocation2] sm:$0xf] %vm295_vm2, %v294_v4  ;;  %706 = vset.pattern.permute.xlu0 %v898_v12  ;;  %707 = vset.pattern.permute.xlu1 %v898_v12  ;;  %v303_v17 = vld [vmem:[%s254_s18] sm:$0xf]  ;;  %s611_s7 = sshll.u32 %s882_s15, 7  ;;  %s286_s20 = scalar_lea.vmem [#allocation12], %s607_s24 }
  0x7b   : > { %v390_v18 = vsel %vm388_vm5, %v303_v17, 0  ;;  %s465_s10 = sshll.u32 %s286_s20, 4  ;;  %s1146_s22 = scalar_lea.hbm %s1199_s3, %s611_s7  ;;  %s1148_s10 = int_to_ptr.vmem [resolvable:$true] %s465_s10 }
  0x7c   : > { %625 = vmatpush3.bf16.msra.mxu1 %v390_v18  ;;  %s451_s28 = scalar_lea.sflag [#allocation8], %s1112_s21  ;;  %s804_s30 = scalar_lea.vmem %s1148_s10, 128 }
  0x7d   : > { %p805_p4 = scmp.ne.s32.totalorder %s1148_s10, %s804_s30  ;;  %p1222_p10 = scmp.ne.s32.totalorder %s1210_s25, 0 }
  0x7e   : > { %v377_v34 = vld [vmem:[#allocation5] sm:$0xff]  ;;  %s899_s15 = smov [#allocation12]  }
  0x7f   : > { %v369_v27 = vld [vmem:[#allocation4] sm:$0xff]  ;;  %p806_p12 = pnand %p805_p4, %p1222_p10  ;;  %s808_s1 = sshll.u32 %s899_s15, 4  ;;  %s809_s1 = int_to_ptr.vmem [resolvable:$false] %s808_s1 }
  0x80   : > { %v352_v13 = vld [vmem:[#allocation3] sm:$0xff]  ;;  %s810_s29 = scalar_lea.vmem %s809_s1, 256  ;;  %p811_p8 = scmp.lt.s32.totalorder %s1148_s10, %s809_s1 }
  0x81   : > { %v304_v5 = vld [vmem:[#allocation2] sm:$0xf]  ;;  %p807_p1 = pneg %p806_p12  ;;  %p812_p9 = scmp.lt.s32.totalorder %s810_s29, %s804_s30 }
  0x82   : > { %621 = vmatmul.mubr.msk.bf16.vlgmr.msra.gmra.mrb[0].mxu0 %vm300_vm0, %v304_v5 }
  0x83   : > { %p813_p6 = por %p812_p9, %p811_p8 }
  0x85   : > { %p814_p13 = pnand %p813_p6, %p807_p1 }
 0x155   : > { %v346_v7 = vpop.f32.mrb[0].mxu0 }
 0x156   : > { %v622_v8 = vpop.f32.mrb[1].mxu0  ;;  %v354_v9 = vsel %vm353_vm4, %v346_v7, -inf }
 0x157   : > { %355 = vmax.xlane.f32.xlu0 %v354_v9  ;;  %v349_v10 = vpop.f32.mrb[2].mxu0 }
 0x158   : > { %v623_v11 = vpop.f32.mrb[3].mxu0 }
 0x1e4   : > { %v356_v14 = vpop.xlane.xlu0 %355 }
 0x1e5   : > { %v357_v15 = vmax.f32 %v352_v13, %v356_v14 }
 0x1e7   : > { %v358_v16 = vsub.f32 %v352_v13, %v357_v15  ;;  %434 = vst.msk [vmem:[#allocation3] sm:$0xff] %vm297_vm3, %v357_v15  ;;  %363 = vperm.xlu0 %706, %v357_v15  }
 0x1e9   : > { %v359_v25 = vmul.f32 1.442695, %v358_v16 }
 0x266   : > { %v364_v19 = vpop.permute.xlu0 %363 }
 0x267   : > { %v366_v20 = vsub.f32 %v346_v7, %v364_v19 }
 0x269   : > { %v367_v21 = vmul.f32 1.442695, %v366_v20 }
 0x26b   : > { %708 = vpow2.f32 %v367_v21 }
 0x26c   : > { %710 = vpow2.f32 %v359_v25 }
 0x275   : > { %v709_v22 = vpop.eup %708 }
 0x276   : > { %v371_v23 = vsel %vm353_vm4, %v709_v22, 0.0  ;;  %v384_v24 = vpack.c.bf16 %v709_v22, %v709_v22  ;;  %v711_v26 = vpop.eup %710 }
 0x277   : > { %372 = vadd.xlane.f32.xlu1 %v371_v23  ;;  %v370_v28 = vmul.f32 %v711_v26, %v369_v27 }
 0x278   : > { %627 = vmatmul.mubr.msk.bf16.vlgmr.msra.gmra.mrb[0].mxu1 %vm353_vm4, %v384_v24 }
 0x288   : > { %380 = vperm.xlu1 %707, %v711_v26  }
 0x304   : > { %v373_v29 = vpop.xlane.xlu1 %372 }
 0x305   : > { %v374_v30 = vadd.f32 %v373_v29, %v370_v28 }
 0x307   : > { %376 = vst.msk [vmem:[#allocation4] sm:$0xff] %vm297_vm3, %v374_v30 }
 0x308   : > { %v381_v35 = vpop.permute.xlu1 %380 }
 0x309   : > { %v383_v36 = vmul.f32 %v381_v35, %v377_v34 }
 0x30e   : > { %v438_v31 = vld [vmem:[#allocation4] sm:$0xff] }
 0x30f   : > { %vm439_vm6 = vcmp.gt.f32.partialorder %v438_v31, 0.0 }
 0x310   : > { %v440_v32 = vsel %vm439_vm6, %v438_v31, 1.0 }
 0x311   : > { %712 = vrcp.f32 %v440_v32 }
 0x31b   : > { %v713_v33 = vpop.eup %712 }
 0x31c   : > { %445 = vperm.xlu1 %707, %v713_v33  }
 0x34b   : > { %v426_v37 = vpop.f32.mrb[0].mxu1 }
 0x34c   : > { %v432_v38 = vadd.f32 %v426_v37, %v383_v36  ;;  %v628_v39 = vpop.f32.mrb[1].mxu1 }
 0x34d   : > { %v429_v40 = vpop.f32.mrb[2].mxu1 }
 0x34e   : > { %433 = vst.msk [vmem:[#allocation5] sm:$0xff] %vm300_vm0, %v432_v38  ;;  %v629_v41 = vpop.f32.mrb[3].mxu1 }
 0x355   : > { %v441_v42 = vld [vmem:[#allocation5] sm:$0xff] }
 0x39b   : > { %v446_v43 = vpop.permute.xlu1 %445 }
 0x39c   : > { %v448_v44 = vmul.f32 %v446_v43, %v441_v42 }
 0x39e   : > { %449 = vst.msk [vmem:[%s286_s20] sm:$0xff] %vm300_vm0, %v448_v44 }
 0x39f   : > { %817 = shalt.err (!%p814_p13)
}
 0x3a0   : > { %s818_s5 = scalar_lea.hbm %s1146_s22, 128  ;;  %s822_s8 = scalar_lea.hbm %s1199_s3, 256 }
 0x3a1   : > { %p819_p11 = scmp.ne.s32.totalorder %s1146_s22, %s818_s5  ;;  %p823_p7 = scmp.lt.u32.totalorder %s1146_s22, %s1199_s3 }
 0x3a2   : > { %p824_p3 = scmp.lt.u32.totalorder %s822_s8, %s818_s5  ;;  %p826_p4 = scmp.lt.u32.totalorder %s818_s5, %s1146_s22 }
 0x3a3   : > { %p820_p2 = pnand %p819_p11, %p1222_p10 }
 0x3a4   : > { %p825_p0 = por %p824_p3, %p823_p7 }
 0x3a5   : > { %p821_p5 = pneg %p820_p2 }
 0x3a6   : > { %p827_p12 = por %p826_p4, %p825_p0 }
 0x3a8   : > { %p828_p1 = pnand %p827_p12, %p821_p5 }
 0x3aa   : > { %831 = shalt.err (!%p828_p1)
}
 0x3ab   : > { %636 = dma.vmem_to_hbm [thread:$0]  (%p1222_p10), %s1148_s10, 128, %s1146_s22, %s451_s28  }
 0x3ac PF: > { %s477_s4 = sand.u32 1, %s870_s12   ;;  %p1223_p8 = scmp.ne.s32.totalorder %s1212_s27, 0 }
 0x3ad   : > { %p1224_p9 = scmp.ge.s32.totalorder %s890_s17, 2  ;;  %s478_s11 = scalar_lea.sflag [#allocation8], %s477_s4 }
 0x3af   : > { %p649_p6 = pnand %p1224_p9, %p1223_p8 }
 0x3b1   : > { %865 = dma.done.wait (!%p649_p6), %s478_s11, 128  }
 0x3b2   : > { %867 = vsyncadd (!%p649_p6), %s478_s11, 4294967168  ;;  %s22_s17 = sadd.s32 1, %s890_s17   ;;  %s1225_s25 = sld [smem:[#allocation18_spill]] }
 0x3b3   : > { %p19_p13 = scmp.ge.s32.totalorder %s22_s17, 4   ;;  %s1226_s15 = sld [smem:[#allocation16_spill]] }
 0x3b4   : > { %s1227_s16 = sld [smem:[#allocation17_spill]]  ;;  %s1228_s12 = smov %s874_s13 }
 0x3b5   : > { %s1229_s13 = smov %s878_s14  ;;  %21 = sbr.rel (!%p19_p13) target bundleno = 10 (0xa), region = 109 }
 0x3b8   : > { %s1230_s14 = smov %s1225_s25 }
 0x3bc   :  { %483 = vsyncpa [#allocation7], 1 }
 0x3bd   :  { %485 = vsyncpa [#allocation7 + $0x1], 1 }
 0x3be   :  { %486 = vsyncpa [#allocation10], 1 }
 0x3bf   :  { %488 = vsyncpa [#allocation10 + $0x1], 1 }
 0x3c0   :  { %489 = vsyncpa [#allocation8], 1 }
 0x3c1   :  { %491 = vsyncpa [#allocation8 + $0x1], 1 }

</bundles_post_ra>
